<compile_context>
chip_gen: v5e
topology: v5e:2x2
jax: 0.10.0
libtpu: 0.0.40
codegen_flags: <defaults>
</compile_context>

<pallas_src>
import functools

import jax
import jax.numpy as jnp
from jax.experimental import pallas as pl
from jax.experimental.pallas import tpu as pltpu


def _layernorm_kernel(x_ref, alpha_ref, bias_ref, o_ref, *, eps: float):
    """Row-wise LayerNorm matching the PyTorch reference.

    x_ref:     (TILE_ROWS, D)  tile of the flattened input
    alpha_ref: (1, D)          scale (broadcast over rows)
    bias_ref:  (1, D)          shift (broadcast over rows)
    """
    x = x_ref[...].astype(jnp.float32)
    d = x.shape[-1]
    mean = jnp.mean(x, axis=-1, keepdims=True)
    # torch.Tensor.std defaults to the unbiased estimator (divide by N-1).
    # The centered tile feeding the reduction is consumed immediately and is
    # recomputed below for the output expression, so no full-tile temp stays
    # live across the reduction (avoids a VMEM scratch store+reload per tile).
    centered = x - mean
    var_unbiased = jnp.sum(centered * centered, axis=-1, keepdims=True) * jnp.float32(
        1.0 / (d - 1)
    )
    denom = jnp.sqrt(var_unbiased) + jnp.float32(eps)
    # Per-row reciprocal on the EUP (separate VLIW slot) instead of a full-tile
    # divide on the VALU; one Newton step restores ~full f32 accuracy cheaply.
    inv = pl.reciprocal(denom, approx=True)
    inv = inv * (jnp.float32(2.0) - denom * inv)
    y = (
        (x - mean) * inv * alpha_ref[...].astype(jnp.float32)
        + bias_ref[...].astype(jnp.float32)
    )
    o_ref[...] = y.astype(o_ref.dtype)


# Safe defaults if the hardware query is unavailable (e.g. interpret mode).
_FALLBACK_TUNING = dict(
    target_block_bytes=2 << 20, vmem_limit_bytes=32 << 20, min_grid_steps=2
)


def _hw_tuning():
    """Generation-aware tuning derived from the chip's VMEM capacity.

    128 MiB VMEM (v5e/v6e): single TensorCore -> largest tiles, no step floor,
        explicit 64 MiB scoped-VMEM limit (v5e's default is only 16 MiB).
    64 MiB VMEM (v7x): two TensorCores -> ~2 MiB tiles, keep >= 4 grid steps so
        the "parallel" row axis is split across the megacore, 32 MiB limit.
    """
    try:
        vmem_cap = int(pltpu.get_tpu_info().vmem_capacity_bytes)
    except Exception:
        return dict(_FALLBACK_TUNING)
    if vmem_cap >= (100 << 20):  # v5e / v6e class (128 MiB, 1 TC per chip)
        return dict(
            target_block_bytes=4 << 20, vmem_limit_bytes=64 << 20, min_grid_steps=1
        )
    # v7x class (64 MiB physical, 32 MiB scoped default, 2 TCs per chip).
    return dict(
        target_block_bytes=2 << 20, vmem_limit_bytes=32 << 20, min_grid_steps=4
    )


def _choose_tile_rows(rows, d, itemsize, target_block_bytes, min_grid_steps):
    """Biggest dtype-native row tile under the target block size, capped by the
    problem size; on multi-TC parts keep at least `min_grid_steps` grid steps."""
    sublane = {4: 8, 2: 16, 1: 32}.get(itemsize, 8)
    t = max(
        sublane, (target_block_bytes // max(d * itemsize, 1)) // sublane * sublane
    )
    # Never (much) larger than the sublane-rounded problem size.
    t = min(t, pl.cdiv(rows, sublane) * sublane)
    # Only multi-TC chips benefit from extra grid steps ("parallel" axis split
    # across TensorCores); single-TC chips keep the largest tile.
    if min_grid_steps > 1 and pl.cdiv(rows, t) < min_grid_steps:
        t_balanced = pl.cdiv(pl.cdiv(rows, min_grid_steps), sublane) * sublane
        t = max(sublane, min(t, t_balanced))
    return int(t)


def layer_norm(x, alpha, bias, *, eps: float = 1e-6, tile_rows=None):
    """Pallas-backed LayerNormalization.forward.

    x:     (..., D) activations (normalization over the last dim)
    alpha: (D,) scale, bias: (D,) shift
    """
    *lead, D = x.shape
    assert D >= 2, "unbiased std needs D >= 2 (torch returns nan for D == 1)"
    rows = 1
    for n in lead:
        rows *= int(n)
    x2 = x.reshape(rows, D)
    itemsize = jnp.dtype(x.dtype).itemsize

    tuning = _hw_tuning()
    if tile_rows is None:
        tile_rows = _choose_tile_rows(
            rows, D, itemsize, tuning["target_block_bytes"], tuning["min_grid_steps"]
        )

    # Ragged row counts: rely on Pallas boundary masking of the partial last
    # block (rows are independent; out-of-bounds tail rows compute garbage that
    # is never written back). No jnp.pad / slice HBM round trip.
    grid = (pl.cdiv(rows, tile_rows),)

    # VMEM budget: double-buffered in+out blocks + f32 compute temps + slack.
    block_bytes = tile_rows * D * itemsize
    needed = 4 * block_bytes + 2 * tile_rows * D * 4 + (2 << 20)
    vmem_limit = int(max(tuning["vmem_limit_bytes"], needed))
    # TODO(synk): for extreme D (a single sublane-row block > ~8 MiB) switch to a
    # D-split two-pass reduction instead of only growing the VMEM limit.

    cost = pl.CostEstimate(
        flops=8 * rows * D,
        transcendentals=rows,
        bytes_accessed=(2 * rows * D + 2 * D) * itemsize,
    )

    out2 = pl.pallas_call(
        functools.partial(_layernorm_kernel, eps=eps),
        out_shape=jax.ShapeDtypeStruct((rows, D), x.dtype),
        grid_spec=pltpu.PrefetchScalarGridSpec(
            num_scalar_prefetch=0,
            grid=grid,
            in_specs=[
                pl.BlockSpec((tile_rows, D), lambda i: (i, 0)),
                pl.BlockSpec((1, D), lambda i: (0, 0)),
                pl.BlockSpec((1, D), lambda i: (0, 0)),
            ],
            out_specs=pl.BlockSpec((tile_rows, D), lambda i: (i, 0)),
        ),
        compiler_params=pltpu.CompilerParams(
            dimension_semantics=("parallel",),
            vmem_limit_bytes=vmem_limit,
        ),
        cost_estimate=cost,
    )(x2, alpha.reshape(1, D), bias.reshape(1, D))

    return out2.reshape(*lead, D)


def _reference_forward(x, alpha, bias, eps=1e-6):
    """Pure-JAX reference mirroring the PyTorch module, for verification."""
    x32 = x.astype(jnp.float32)
    mean = jnp.mean(x32, axis=-1, keepdims=True)
    diff = x32 - mean
    var = jnp.sum(diff * diff, axis=-1, keepdims=True) / (x.shape[-1] - 1)
    std = jnp.sqrt(var)
    return (alpha * diff / (std + eps) + bias).astype(x.dtype)


if __name__ == "__main__":
    key = jax.random.PRNGKey(0)
    kx, k2 = jax.random.split(key)

    # Small but lane-dense demo shape (D multiple of 128 keeps stores unmasked).
    B, S, D = 2, 8, 128
    x = jax.random.normal(kx, (B, S, D), dtype=jnp.float32)
    # LayerNormalization params exactly as the module's lazy init (ones/zeros).
    alpha = jnp.ones((D,), dtype=jnp.float32)
    bias = jnp.zeros((D,), dtype=jnp.float32)

    out = jax.block_until_ready(layer_norm(x, alpha, bias))
    ref = _reference_forward(x, alpha, bias)
    assert out.shape == (B, S, D), out.shape
    assert jnp.allclose(out, ref, atol=1e-4, rtol=1e-4), "mismatch vs reference"

    # Ragged row count (3*5 = 15 rows) exercises the masked partial-tail block
    # (no pad/slice round trip anymore).
    x_r = jax.random.normal(k2, (3, 5, 256), dtype=jnp.float32)
    a_r = jnp.ones((256,), dtype=jnp.float32)
    b_r = jnp.zeros((256,), dtype=jnp.float32)
    out_r = jax.block_until_ready(layer_norm(x_r, a_r, b_r))
    ref_r = _reference_forward(x_r, a_r, b_r)
    assert out_r.shape == x_r.shape, out_r.shape
    assert jnp.allclose(out_r, ref_r, atol=1e-4, rtol=1e-4), "mismatch (ragged)"

    print("KERNEL_OK")
</pallas_src>

<mosaic_0001>
module attributes {stable_mosaic.version = 11 : i64} {
  func.func @_layernorm_kernel(%arg0: i32, %arg1: memref<8x128xf32, #tpu.memory_space<vmem>>, %arg2: memref<1x128xf32, #tpu.memory_space<vmem>>, %arg3: memref<1x128xf32, #tpu.memory_space<vmem>>, %arg4: memref<8x128xf32, #tpu.memory_space<vmem>>) attributes {dimension_semantics = [#tpu.dimension_semantics<parallel>], iteration_bounds = array<i64: 2>, scalar_prefetch = 0 : i64, scratch_operands = 0 : i64, tpu.core_type = #tpu.core_type<tc>, window_params = [{transform_indices = @transform_0, window_bounds = array<i64: 8, 128>}, {pipeline_mode = #tpu.pipeline_mode<synchronous>, transform_indices = @transform_1, window_bounds = array<i64: 1, 128>}, {pipeline_mode = #tpu.pipeline_mode<synchronous>, transform_indices = @transform_2, window_bounds = array<i64: 1, 128>}, {transform_indices = @transform_3, window_bounds = array<i64: 8, 128>}]} {
    %c0 = arith.constant 0 : index
    %c0_0 = arith.constant 0 : index
    %0 = vector.load %arg1[%c0, %c0_0] : memref<8x128xf32, #tpu.memory_space<vmem>>, vector<8x128xf32>
    %cst = arith.constant dense<0.000000e+00> : vector<8xf32>
    %1 = vector.multi_reduction <add>, %0, %cst [1] : vector<8x128xf32> to vector<8xf32>
    %2 = vector.shape_cast %1 : vector<8xf32> to vector<8x1xf32>
    %cst_1 = arith.constant 1.280000e+02 : f32
    %3 = vector.broadcast %cst_1 : f32 to vector<8x1xf32>
    %4 = arith.divf %2, %3 : vector<8x1xf32>
    %5 = vector.broadcast %4 : vector<8x1xf32> to vector<8x128xf32>
    %6 = arith.subf %0, %5 : vector<8x128xf32>
    %7 = arith.mulf %6, %6 : vector<8x128xf32>
    %cst_2 = arith.constant dense<0.000000e+00> : vector<8xf32>
    %8 = vector.multi_reduction <add>, %7, %cst_2 [1] : vector<8x128xf32> to vector<8xf32>
    %9 = vector.shape_cast %8 : vector<8xf32> to vector<8x1xf32>
    %cst_3 = arith.constant 0.00787401571 : f32
    %10 = vector.broadcast %cst_3 : f32 to vector<8x1xf32>
    %11 = arith.mulf %9, %10 : vector<8x1xf32>
    %12 = math.sqrt %11 : vector<8x1xf32>
    %cst_4 = arith.constant 9.99999997E-7 : f32
    %13 = vector.broadcast %cst_4 : f32 to vector<8x1xf32>
    %14 = arith.addf %12, %13 : vector<8x1xf32>
    %15 = tpu.reciprocal %14 {approx = true} : vector<8x1xf32> -> vector<8x1xf32>
    %16 = arith.mulf %14, %15 : vector<8x1xf32>
    %cst_5 = arith.constant 2.000000e+00 : f32
    %17 = vector.broadcast %cst_5 : f32 to vector<8x1xf32>
    %18 = arith.subf %17, %16 : vector<8x1xf32>
    %19 = arith.mulf %15, %18 : vector<8x1xf32>
    %20 = vector.broadcast %4 : vector<8x1xf32> to vector<8x128xf32>
    %21 = arith.subf %0, %20 : vector<8x128xf32>
    %22 = vector.broadcast %19 : vector<8x1xf32> to vector<8x128xf32>
    %23 = arith.mulf %21, %22 : vector<8x128xf32>
    %c0_6 = arith.constant 0 : index
    %c0_7 = arith.constant 0 : index
    %24 = vector.load %arg2[%c0_6, %c0_7] : memref<1x128xf32, #tpu.memory_space<vmem>>, vector<1x128xf32>
    %25 = vector.broadcast %24 : vector<1x128xf32> to vector<8x128xf32>
    %26 = arith.mulf %23, %25 : vector<8x128xf32>
    %c0_8 = arith.constant 0 : index
    %c0_9 = arith.constant 0 : index
    %27 = vector.load %arg3[%c0_8, %c0_9] : memref<1x128xf32, #tpu.memory_space<vmem>>, vector<1x128xf32>
    %28 = vector.broadcast %27 : vector<1x128xf32> to vector<8x128xf32>
    %29 = arith.addf %26, %28 : vector<8x128xf32>
    %c0_10 = arith.constant 0 : index
    %c0_11 = arith.constant 0 : index
    %30 = vector.load %arg4[%c0_10, %c0_11] : memref<8x128xf32, #tpu.memory_space<vmem>>, vector<8x128xf32>
    tpu.vector_store %arg4[%c0_10, %c0_11], %29 {strides = array<i32>} : memref<8x128xf32, #tpu.memory_space<vmem>>, vector<8x128xf32>,
    return
  }
  func.func @transform_0(%arg0: i32) -> (i32, i32) {
    %c0_i32 = arith.constant 0 : i32
    %c0_i32_0 = arith.constant 0 : i32
    return %arg0, %c0_i32 : i32, i32
  }
  func.func @transform_1(%arg0: i32) -> (i32, i32) {
    %c0_i32 = arith.constant 0 : i32
    %c0_i32_0 = arith.constant 0 : i32
    %c0_i32_1 = arith.constant 0 : i32
    return %c0_i32, %c0_i32_0 : i32, i32
  }
  func.func @transform_2(%arg0: i32) -> (i32, i32) {
    %c0_i32 = arith.constant 0 : i32
    %c0_i32_0 = arith.constant 0 : i32
    %c0_i32_1 = arith.constant 0 : i32
    return %c0_i32, %c0_i32_0 : i32, i32
  }
  func.func @transform_3(%arg0: i32) -> (i32, i32) {
    %c0_i32 = arith.constant 0 : i32
    %c0_i32_0 = arith.constant 0 : i32
    return %arg0, %c0_i32 : i32, i32
  }
}

</mosaic_0001>

<bundles_post_ra>
// kernel: tpu_custom_call.1
= control target key start
LH: loop header
LB: loop body
LE: loop exit
PB: predicated region body
PF: predicated region fallthrough
CT: control target
= control target key end

     0   :  { %8 = vsyncpa [#allocation3], 0  ;;  %s723_s0 = inlined_call_operand.hbm [shape: f32[16,128], index: 0, kind: input, shape index: {}]   ;;  %s724_s1 = inlined_call_operand.hbm [shape: f32[1,128], index: 1, kind: input, shape index: {}]   ;;  %s725_s2 = inlined_call_operand.vmem [shape: f32[1,128], index: 2, kind: input, shape index: {}]   ;;  %s726_s3 = inlined_call_operand.hbm [shape: f32[16,128], index: 3, kind: output, shape index: {}]  }
   0x1   :  { %10 = vsyncpa [#allocation3 + $0x1], 0 }
   0x2   :  { %11 = vsyncpa [#allocation6], 0 }
   0x3   :  { %12 = vsyncpa [#allocation4], 0 }
   0x4   :  { %14 = vsyncpa [#allocation4 + $0x1], 0  ;;  %s578_s12 = smov 0   ;;  %s580_s13 = smov 0  }
   0x5   :  { %s582_s14 = smov 0   ;;  %s584_s15 = smov 0  }
   0x6 LB: > { %s599_s16 = sadd.s32 4294967295, %s554_s15   ;;  %s344_s17 = sadd.s32 4294967294, %s554_s15   ;;  %s554_s15 = sphi %s584_s15, %s736_s15   ;;  %s550_s14 = sphi %s582_s14, %s735_s14   ;;  %s546_s13 = sphi %s580_s13, %s734_s13   ;;  %s542_s12 = sphi %s578_s12, %s733_s12  }
   0x7   : > { %p40_p0 = scmp.ne.s32.totalorder %s546_s13, %s542_s12  ;;  %p41_p1 = scmp.eq.s32.totalorder %s599_s16, 0 }
   0x8   : > { %p106_p2 = scmp.eq.s32.totalorder %s599_s16, 1  ;;  %p112_p3 = scmp.eq.s32.totalorder %s344_s17, 1 }
   0x9   : > { %p608_p4 = por %p41_p1, %p40_p0  ;;  %p345_p5 = scmp.ge.s32.totalorder %s554_s15, 1 }
   0xa   : > { %p613_p6 = por %p112_p3, %p40_p0  ;;  %p119_p7 = scmp.lt.s32.totalorder %s554_s15, 3 }
   0xb   : > { %s131_s22 = sshll.u32 %s724_s1, 4  ;;  %s556_s24 = smov [#allocation5]   ;;  %s132_s22 = int_to_ptr.hbm [resolvable:$true] %s131_s22 }
   0xc   : > { %p621_p8 = pnand %p345_p5, %p119_p7  ;;  %s133_s25 = sshll.u32 %s556_s24, 4  ;;  %s134_s25 = int_to_ptr.vmem [resolvable:$true] %s133_s25 }
   0xd   : > { %s631_s26 = sadd.s32 1, %s554_s15   ;;  %s27_s27 = sadd.s32 1, %s550_s14 }
   0xe   : > { %p366_p10 = pneg %p621_p8  ;;  %s24_s28 = ssub.s32 %s554_s15, %s631_s26 }
   0xf   : > { %p25_p12 = scmp.eq.s32.totalorder %s24_s28, 0  ;;  %p34_p13 = scmp.ne.s32.totalorder %s550_s14, %s546_s13 }
  0x10   : > { %p367_p11 = pnand %p366_p10, %p41_p1  ;;  %p35_p0 = scmp.eq.s32.totalorder %s554_s15, 0 }
  0x11   : > { %s640_s29 = scalar_select %p25_p12, %s550_s14, %s27_s27  }
  0x12   : > { %369 = dma.hbm_to_vmem [thread:$0]  (!%p367_p11), %s132_s22, 16, %s134_s25, [#allocation6]  }
  0x13   : > { %p644_p3 = por %p106_p2, %p34_p13  ;;  %p379_p5 = scmp.lt.s32.totalorder %s554_s15, 2 }
  0x14   : > { %s147_s4 = sand.u32 1, %s550_s14   ;;  %s349_s5 = sshll.u32 %s554_s15, 3 }
  0x15   : > { %p36_p7 = por %p35_p0, %p34_p13  ;;  %s348_s6 = sshll.u32 %s147_s4, 3 }
  0x16   : > { %s155_s9 = scalar_lea.hbm %s723_s0, %s349_s5  ;;  %s151_s11 = scalar_lea.vmem [#allocation2], %s348_s6 }
  0x17   : > { %s157_s10 = sshll.u32 %s155_s9, 4  ;;  %s159_s17 = sshll.u32 %s151_s11, 4  ;;  %s158_s10 = int_to_ptr.hbm [resolvable:$true] %s157_s10  ;;  %s160_s17 = int_to_ptr.vmem [resolvable:$true] %s159_s17 }
  0x18   : > { %p654_p10 = pnand %p379_p5, %p36_p7  ;;  %s148_s21 = scalar_lea.sflag [#allocation3], %s147_s4 }
  0x19   : > { %s454_s22 = sshra.s32 %s158_s10, 4  ;;  %s461_s28 = scalar_lea.hbm %s723_s0, 16  ;;  %s455_s22 = int_to_ptr.hbm [resolvable:$true] %s454_s22 }
  0x1a   : > { %s456_s24 = scalar_lea.hbm %s455_s22, 8  ;;  %p458_p11 = pneg %p654_p10 }
  0x1b   : > { %p457_p2 = scmp.ne.s32.totalorder %s455_s22, %s456_s24  ;;  %p462_p0 = scmp.lt.s32.totalorder %s455_s22, %s723_s0 }
  0x1c   : > { %p463_p5 = scmp.lt.s32.totalorder %s461_s28, %s456_s24 }
  0x1d   : > { %p459_p12 = pnand %p458_p11, %p457_p2 }
  0x1e   : > { %p464_p7 = por %p463_p5, %p462_p0 }
  0x1f   : > { %p460_p13 = pneg %p459_p12 }
  0x21   : > { %p465_p9 = pnand %p464_p7, %p460_p13 }
  0x23   : > { %468 = shalt.err (!%p465_p9)
}
  0x24   : > { %373 = dma.hbm_to_vmem [thread:$0]  (!%p654_p10), %s158_s10, 128, %s160_s17, %s148_s21  }
  0x25   : > { %168 = sbr.rel (%p621_p8) target bundleno = 331 (0x14b), region = 32  ;;  %s671_s4 = sand.u32 (!%p621_p8), 1, %s546_s13  }
  0x26   : > { %s351_s7 = sshll.u32 (!%p621_p8), %s671_s4, 3  ;;  %s171_s8 = scalar_lea.sflag (!%p621_p8), [#allocation3], %s671_s4 }
  0x27   : > { %s174_s9 = scalar_lea.vmem (!%p621_p8), [#allocation2], %s351_s7 }
  0x2a   : > { %529 = dma.done.wait (%p608_p4), %s171_s8, 128  }
  0x2b   : > { %531 = vsyncadd (%p608_p4), %s171_s8, 4294967168 }
  0x2c   : > { %533 = dma.done.wait (%p41_p1), [#allocation6], 16  }
  0x2d   : > { %535 = vsyncadd (%p41_p1), [#allocation6], 4294967280  ;;  %v203_v0 = vld [vmem:[%s174_s9] sm:$0xff]  ;;  %v557_v1 = vmov 128.0   ;;  %s355_s18 = sshll.u32 %s599_s16, 3  ;;  %s202_s21 = scalar_lea.vmem [#allocation7], %s351_s7 }
  0x2e   : > { %204 = vadd.xlane.f32.xlu0 %v203_v0  ;;  %418 = vrcp.f32 %v557_v1  ;;  %v416_v29 = vld [vmem:[#allocation5] ss:$0 sm:$0xff]  ;;  %s259_s11 = scalar_lea.hbm %s726_s3, %s355_s18  ;;  %v417_v31 = vld [vmem:[%s725_s2] ss:$0 sm:$0xff]  ;;  %s261_s22 = sshll.u32 %s202_s21, 4  ;;  %s262_s22 = int_to_ptr.vmem [resolvable:$true] %s261_s22 }
  0x2f   : > { %s263_s24 = sshll.u32 %s259_s11, 4  ;;  %s249_s16 = scalar_lea.sflag [#allocation4], %s671_s4  ;;  %s264_s24 = int_to_ptr.hbm [resolvable:$true] %s263_s24 }
  0x30   : > { %s498_s25 = sshra.s32 %s264_s24, 4  ;;  %s504_s6 = scalar_lea.hbm %s726_s3, 16  ;;  %s499_s25 = int_to_ptr.hbm [resolvable:$true] %s498_s25 }
  0x31   : > { %s500_s27 = scalar_lea.hbm %s499_s25, 8  ;;  %p505_p9 = scmp.lt.s32.totalorder %s499_s25, %s726_s3 }
  0x32   : > { %p501_p1 = scmp.ne.s32.totalorder %s499_s25, %s500_s27  ;;  %p506_p10 = scmp.lt.s32.totalorder %s504_s6, %s500_s27 }
  0x34   : > { %v419_v2 = vpop.eup %418  ;;  %p502_p4 = pnand %p501_p1, %p644_p3  ;;  %p507_p2 = por %p506_p10, %p505_p9 }
  0x35   : > { %v207_v3 = vmul.f32 128.0, %v419_v2  ;;  %vm211_vm0 = vweird.f32 %v419_v2 }
  0x36   : > { %p503_p8 = pneg %p502_p4 }
  0x37   : > { %v208_v4 = vsub.f32 1.0, %v207_v3 }
  0x38   : > { %p508_p11 = pnand %p507_p2, %p503_p8 }
  0x39   : > { %v209_v5 = vmul.f32 %v419_v2, %v208_v4 }
  0x3b   : > { %v210_v6 = vadd.f32 %v419_v2, %v209_v5 }
  0x3d   : > { %v212_v7 = vsel %vm211_vm0, %v419_v2, %v210_v6 }
  0xa1   : > { %v205_v8 = vpop.xlane.xlu0 %204 }
  0xa2   : > { %v213_v9 = vmul.f32 %v212_v7, %v205_v8 }
  0xa4   : > { %v214_v10 = vsub.f32 %v203_v0, %v213_v9 }
  0xa6   : > { %v215_v11 = vmul.f32 %v214_v10, %v214_v10 }
  0xa8   : > { %216 = vadd.xlane.f32.xlu0 %v215_v11 }
 0x11b   : > { %v217_v12 = vpop.xlane.xlu0 %216 }
 0x11c   : > { %v218_v13 = vmul.f32 0.007874016, %v217_v12 }
 0x11e   : > { %420 = vrsqrt.f32 %v218_v13  ;;  %vm226_vm1 = vcmp.eq.f32.partialorder %v218_v13, inf  ;;  %v229_v21 = vand.u32 2147483648, %v218_v13  ;;  %vm228_vm2 = vcmp.eq.f32.partialorder %v218_v13, 0.0 }
 0x124   : > { %v421_v14 = vpop.eup %420 }
 0x125   : > { %v220_v15 = vmul.f32 %v421_v14, %v218_v13 }
 0x127   : > { %v221_v16 = vmul.f32 %v421_v14, %v220_v15 }
 0x129   : > { %v222_v17 = vmul.f32 0.5, %v221_v16 }
 0x12b   : > { %v223_v18 = vsub.f32 1.5, %v222_v17 }
 0x12d   : > { %v224_v19 = vmul.f32 %v421_v14, %v223_v18 }
 0x12f   : > { %v225_v20 = vmul.f32 %v224_v19, %v218_v13 }
 0x131   : > { %v227_v22 = vsel %vm226_vm1, %v218_v13, %v225_v20 }
 0x132   : > { %v230_v23 = vsel %vm228_vm2, %v229_v21, %v227_v22 }
 0x133   : > { %v231_v24 = vadd.f32 1e-06, %v230_v23 }
 0x135   : > { %422 = vrcp.f32 %v231_v24 }
 0x13b   : > { %v423_v25 = vpop.eup %422 }
 0x13c   : > { %v233_v26 = vmul.f32 %v423_v25, %v231_v24 }
 0x13e   : > { %v234_v27 = vsub.f32 2.0, %v233_v26 }
 0x140   : > { %v235_v28 = vmul.f32 %v423_v25, %v234_v27 }
 0x142   : > { %v236_v30 = vmul.f32 %v235_v28, %v214_v10 }
 0x144   : > { %v241_v32 = vmul.f32 %v416_v29, %v236_v30 }
 0x146   : > { %v246_v33 = vadd.f32 %v417_v31, %v241_v32 }
 0x148   : > { %247 = vst [vmem:[%s202_s21] sm:$0xff] %v246_v33 }
 0x149   : > { %511 = shalt.err (!%p508_p11)
}
 0x14a   : > { %364 = dma.vmem_to_hbm [thread:$0]  (%p644_p3), %s262_s22, 128, %s264_s24, %s249_s16  }
 0x14b PF: > { %s275_s4 = sand.u32 1, %s542_s12   ;;  %p732_p12 = scmp.ge.s32.totalorder %s554_s15, 2 }
 0x14c   : > { %s276_s9 = scalar_lea.sflag [#allocation4], %s275_s4 }
 0x14d   : > { %p375_p13 = pnand %p732_p12, %p613_p6 }
 0x14f   : > { %p376_p0 = pneg %p375_p13 }
 0x151   : > { %537 = dma.done.wait (%p376_p0), %s276_s9, 128  }
 0x152   : > { %539 = vsyncadd (%p376_p0), %s276_s9, 4294967168  ;;  %p17_p5 = scmp.ge.s32.totalorder %s631_s26, 4   ;;  %s733_s12 = smov %s546_s13 }
 0x153   : > { %s734_s13 = smov %s550_s14  ;;  %s735_s14 = smov %s640_s29 }
 0x154   : > { %s736_s15 = smov %s631_s26  ;;  %19 = sbr.rel (!%p17_p5) target bundleno = 6 (0x6), region = 81 }
 0x159   :  { %282 = vsyncpa [#allocation3], 1 }
 0x15a   :  { %284 = vsyncpa [#allocation3 + $0x1], 1 }
 0x15b   :  { %285 = vsyncpa [#allocation6], 1 }
 0x15c   :  { %286 = vsyncpa [#allocation4], 1 }
 0x15d   :  { %288 = vsyncpa [#allocation4 + $0x1], 1 }

</bundles_post_ra>
